<compile_context>
chip_gen: v6e
topology: v6e:2x2x1
jax: 0.10.0
libtpu: 0.0.40
codegen_flags: <defaults>
</compile_context>

<pallas_src>
import functools

import jax
import jax.numpy as jnp
from jax.experimental import pallas as pl
from jax.experimental.pallas import tpu as pltpu


def _se_kernel(x_ref, w1t_ref, b1_ref, w2t_ref, b2_ref, o_ref, *, inv_hw):
    # x_ref:   (Bt, C, HW)   batch tile, channels on sublanes, spatial on lanes
    # w1t_ref: (C, MID)      conv1 weight transposed (conv1.weight is (MID, C))
    # b1_ref:  (1, MID)
    # w2t_ref: (MID, C)      conv2 weight transposed (conv2.weight is (C, MID))
    # b2_ref:  (1, C)
    bt, c, hw = x_ref.shape
    x = x_ref[...]                                      # I/O dtype, no f32 slab

    # --- squeeze: spatial mean, accumulated in f32 ---------------------------
    if x_ref.dtype == jnp.float32:
        # Already f32: a plain cross-lane reduce is exact and avoids MXU passes.
        pooled = jnp.sum(x, axis=2) * inv_hw                          # (Bt, C)
    else:
        # Sub-f32 I/O (bf16): contract with a ones vector on the otherwise-idle
        # MXU -- native low-precision inputs, exact f32 accumulation, and no
        # slab-sized f32 cast on the VPU.
        ones = jnp.ones((bt, hw, 1), dtype=x_ref.dtype)
        psum = jnp.einsum("bch,bhk->bck", x, ones,
                          preferred_element_type=jnp.float32)         # (Bt,C,1)
        pooled = psum.reshape(bt, c) * inv_hw                         # (Bt, C)

    # --- excitation: conv1 (1x1) + Swish, conv2 (1x1) + sigmoid --------------
    # Weights go to the MXU in their own (possibly bf16) dtype; accumulate f32.
    y1 = jnp.dot(pooled.astype(w1t_ref.dtype), w1t_ref[...],
                 preferred_element_type=jnp.float32)
    y1 = y1 + b1_ref[...].astype(jnp.float32)                         # (Bt, MID)
    y1 = y1 * jax.nn.sigmoid(y1)                                      # Swish, f32

    y2 = jnp.dot(y1.astype(w2t_ref.dtype), w2t_ref[...],
                 preferred_element_type=jnp.float32)
    y2 = y2 + b2_ref[...].astype(jnp.float32)                         # (Bt, C)
    gate = jax.nn.sigmoid(y2)                                         # f32

    # --- scale: input * gate, in the I/O dtype (no f32 slab temp) ------------
    o_ref[...] = x * gate.astype(x_ref.dtype)[:, :, None]


def _vmem_limit_bytes():
    # ~Half of physical VMEM: ~32 MiB on the 64 MiB v7x part, ~64 MiB on the
    # 128 MiB v5e/v6e parts.  Conservative 32 MiB fallback if the query fails.
    try:
        cap = int(pltpu.get_tpu_info().vmem_capacity_bytes)
        return max(32 * 1024 * 1024, min(cap // 2, 96 * 1024 * 1024))
    except Exception:
        return 32 * 1024 * 1024


def _choose_batch_tile(n, bt_fit):
    """Largest divisor of n that fits VMEM, preferring >=4 (and even) grid steps."""
    bt_fit = max(1, int(bt_fit))
    divs = [d for d in range(1, n + 1) if n % d == 0 and d <= bt_fit]
    min_steps = min(4, n)
    for want_even in (True, False):
        for d in sorted(divs, reverse=True):
            steps = n // d
            if steps >= min_steps and (steps % 2 == 0 or not want_even):
                return d
    return max(divs)


def squeeze_excitation(x, w1, b1, w2, b2):
    """x: (N, C, H, W); w1: (MID, C); b1: (MID,); w2: (C, MID); b2: (C,)."""
    N, C, H, W = x.shape
    MID = w1.shape[0]
    assert w2.shape[0] == C, "input * gate broadcast requires out_channels == in_channels"
    HW = H * W

    # Contiguous (free) flatten of the spatial dims; no padding, no slicing.
    x2 = x.reshape(N, C, HW)

    itemsize = jnp.dtype(x.dtype).itemsize
    vmem_limit = _vmem_limit_bytes()
    # Per-element VMEM bytes: 2x double-buffered input + 2x double-buffered
    # output slabs plus up to two slab-sized in-kernel values (loaded x /
    # gated product), all in the I/O dtype -- no f32 slab temps remain.
    per_elem_bytes = 6 * itemsize
    slab_budget = (vmem_limit * 3) // 4
    bt_fit = slab_budget // (per_elem_bytes * C * HW)
    Bt = _choose_batch_tile(N, bt_fit)
    # TODO(synk): if a single (1, C, HW) slab ever exceeds VMEM (huge C*H*W),
    # fall back to a two-pass reduce-then-gate pipeline over spatial tiles.

    w1t = jnp.transpose(w1)            # (C, MID)
    w2t = jnp.transpose(w2)            # (MID, C)
    b1r = b1.reshape(1, MID)
    b2r = b2.reshape(1, C)

    cost = pl.CostEstimate(
        flops=2 * N * C * HW            # ones-vector pooling contraction
        + 2 * N * C * MID * 2           # the two 1x1 convs
        + N * C * HW,                   # gate multiply
        transcendentals=N * (MID + C),  # swish + gate sigmoids
        bytes_accessed=2 * N * C * HW * itemsize,
    )

    kernel = functools.partial(_se_kernel, inv_hw=1.0 / HW)
    out = pl.pallas_call(
        kernel,
        out_shape=jax.ShapeDtypeStruct((N, C, HW), x.dtype),
        grid=(N // Bt,),
        in_specs=[
            # Trailing (C, HW) dims are full array extents => exempt from the
            # (8,128) divisibility rule; only the batch axis is tiled.
            pl.BlockSpec((Bt, C, HW), lambda n: (n, 0, 0)),   # x batch tile
            pl.BlockSpec((C, MID), lambda n: (0, 0)),         # W1^T (replicated)
            pl.BlockSpec((1, MID), lambda n: (0, 0)),         # b1
            pl.BlockSpec((MID, C), lambda n: (0, 0)),         # W2^T (replicated)
            pl.BlockSpec((1, C), lambda n: (0, 0)),           # b2
        ],
        out_specs=pl.BlockSpec((Bt, C, HW), lambda n: (n, 0, 0)),
        compiler_params=pltpu.CompilerParams(
            dimension_semantics=("parallel",),
            vmem_limit_bytes=vmem_limit,
        ),
        cost_estimate=cost,
    )(x2, w1t, b1r, w2t, b2r)

    return out.reshape(N, C, H, W)


def se_reference(x, w1, b1, w2, b2):
    """Pure-JAX reference mirroring the PyTorch forward (f32 compute)."""
    xf = x.astype(jnp.float32)
    pooled = jnp.mean(xf, axis=(2, 3), keepdims=True)                        # (N,C,1,1)
    y1 = (jnp.einsum('nchw,mc->nmhw', pooled, w1.astype(jnp.float32))
          + b1.astype(jnp.float32)[None, :, None, None])
    y1 = y1 * jax.nn.sigmoid(y1)                                             # Swish
    y2 = (jnp.einsum('nmhw,cm->nchw', y1, w2.astype(jnp.float32))
          + b2.astype(jnp.float32)[None, :, None, None])
    return (xf * jax.nn.sigmoid(y2)).astype(x.dtype)


if __name__ == "__main__":
    N, C, H, W = 2, 4, 16, 16
    MID = 8  # mid_channels

    key = jax.random.PRNGKey(0)
    kx, k1, k2, k3, k4 = jax.random.split(key, 5)

    x = jax.random.normal(kx, (N, C, H, W), dtype=jnp.float32)
    w1 = jax.random.normal(k1, (MID, C), dtype=jnp.float32) * 0.1   # conv1.weight (MID,C,1,1)
    b1 = jax.random.normal(k2, (MID,), dtype=jnp.float32) * 0.1     # conv1.bias
    w2 = jax.random.normal(k3, (C, MID), dtype=jnp.float32) * 0.1   # conv2.weight (C,MID,1,1)
    b2 = jax.random.normal(k4, (C,), dtype=jnp.float32) * 0.1       # conv2.bias

    # float32 path
    out = jax.block_until_ready(squeeze_excitation(x, w1, b1, w2, b2))
    ref = se_reference(x, w1, b1, w2, b2)
    assert out.shape == ref.shape == (N, C, H, W)
    assert jnp.allclose(out, ref, atol=1e-5, rtol=1e-5), "f32 mismatch vs reference"

    # bfloat16 I/O path (f32 accumulation inside the kernel)
    xb, w1b, b1b = x.astype(jnp.bfloat16), w1.astype(jnp.bfloat16), b1.astype(jnp.bfloat16)
    w2b, b2b = w2.astype(jnp.bfloat16), b2.astype(jnp.bfloat16)
    out_b = jax.block_until_ready(squeeze_excitation(xb, w1b, b1b, w2b, b2b))
    ref_b = se_reference(xb, w1b, b1b, w2b, b2b)
    assert out_b.dtype == jnp.bfloat16
    assert jnp.allclose(out_b.astype(jnp.float32), ref_b.astype(jnp.float32),
                        atol=2e-2, rtol=2e-2), "bf16 mismatch vs reference"

    print("KERNEL_OK")
</pallas_src>

<mosaic_0001>
module attributes {stable_mosaic.version = 11 : i64} {
  func.func @_se_kernel(%arg0: i32, %arg1: memref<1x4x256xf32, #tpu.memory_space<vmem>>, %arg2: memref<4x8xf32, #tpu.memory_space<vmem>>, %arg3: memref<1x8xf32, #tpu.memory_space<vmem>>, %arg4: memref<8x4xf32, #tpu.memory_space<vmem>>, %arg5: memref<1x4xf32, #tpu.memory_space<vmem>>, %arg6: memref<1x4x256xf32, #tpu.memory_space<vmem>>) attributes {dimension_semantics = [#tpu.dimension_semantics<parallel>], iteration_bounds = array<i64: 2>, scalar_prefetch = 0 : i64, scratch_operands = 0 : i64, tpu.core_type = #tpu.core_type<tc>, window_params = [{transform_indices = @transform_0, window_bounds = array<i64: 1, 4, 256>}, {pipeline_mode = #tpu.pipeline_mode<synchronous>, transform_indices = @transform_1, window_bounds = array<i64: 4, 8>}, {pipeline_mode = #tpu.pipeline_mode<synchronous>, transform_indices = @transform_2, window_bounds = array<i64: 1, 8>}, {pipeline_mode = #tpu.pipeline_mode<synchronous>, transform_indices = @transform_3, window_bounds = array<i64: 8, 4>}, {pipeline_mode = #tpu.pipeline_mode<synchronous>, transform_indices = @transform_4, window_bounds = array<i64: 1, 4>}, {transform_indices = @transform_5, window_bounds = array<i64: 1, 4, 256>}]} {
    %c0 = arith.constant 0 : index
    %c0_0 = arith.constant 0 : index
    %c0_1 = arith.constant 0 : index
    %0 = vector.load %arg1[%c0, %c0_0, %c0_1] : memref<1x4x256xf32, #tpu.memory_space<vmem>>, vector<1x4x256xf32>
    %cst = arith.constant dense<0.000000e+00> : vector<1x4xf32>
    %1 = vector.multi_reduction <add>, %0, %cst [2] : vector<1x4x256xf32> to vector<1x4xf32>
    %cst_2 = arith.constant 3.906250e-03 : f32
    %2 = vector.broadcast %cst_2 : f32 to vector<1x4xf32>
    %3 = arith.mulf %1, %2 : vector<1x4xf32>
    %c0_3 = arith.constant 0 : index
    %c0_4 = arith.constant 0 : index
    %4 = vector.load %arg2[%c0_3, %c0_4] : memref<4x8xf32, #tpu.memory_space<vmem>>, vector<4x8xf32>
    %cst_5 = arith.constant dense<0.000000e+00> : vector<1x8xf32>
    %5 = tpu.matmul %3, %4, %cst_5 {dimension_numbers = #tpu.dot_dimension_numbers<[1], [0], [0], [1], [0, 0, 1, 1], [], []>} : vector<1x4xf32>, vector<4x8xf32>, vector<1x8xf32> -> vector<1x8xf32>
    %c0_6 = arith.constant 0 : index
    %c0_7 = arith.constant 0 : index
    %6 = vector.load %arg3[%c0_6, %c0_7] : memref<1x8xf32, #tpu.memory_space<vmem>>, vector<1x8xf32>
    %7 = arith.addf %5, %6 : vector<1x8xf32>
    %8 = arith.negf %7 : vector<1x8xf32>
    %9 = math.exp %8 : vector<1x8xf32>
    %cst_8 = arith.constant 1.000000e+00 : f32
    %10 = vector.broadcast %cst_8 : f32 to vector<1x8xf32>
    %11 = arith.addf %10, %9 : vector<1x8xf32>
    %12 = arith.divf %10, %11 : vector<1x8xf32>
    %13 = arith.mulf %7, %12 : vector<1x8xf32>
    %c0_9 = arith.constant 0 : index
    %c0_10 = arith.constant 0 : index
    %14 = vector.load %arg4[%c0_9, %c0_10] : memref<8x4xf32, #tpu.memory_space<vmem>>, vector<8x4xf32>
    %cst_11 = arith.constant dense<0.000000e+00> : vector<1x4xf32>
    %15 = tpu.matmul %13, %14, %cst_11 {dimension_numbers = #tpu.dot_dimension_numbers<[1], [0], [0], [1], [0, 0, 1, 1], [], []>} : vector<1x8xf32>, vector<8x4xf32>, vector<1x4xf32> -> vector<1x4xf32>
    %c0_12 = arith.constant 0 : index
    %c0_13 = arith.constant 0 : index
    %16 = vector.load %arg5[%c0_12, %c0_13] : memref<1x4xf32, #tpu.memory_space<vmem>>, vector<1x4xf32>
    %17 = arith.addf %15, %16 : vector<1x4xf32>
    %18 = arith.negf %17 : vector<1x4xf32>
    %19 = math.exp %18 : vector<1x4xf32>
    %cst_14 = arith.constant 1.000000e+00 : f32
    %20 = vector.broadcast %cst_14 : f32 to vector<1x4xf32>
    %21 = arith.addf %20, %19 : vector<1x4xf32>
    %22 = arith.divf %20, %21 : vector<1x4xf32>
    %23 = vector.shape_cast %22 : vector<1x4xf32> to vector<1x4x1xf32>
    %24 = vector.broadcast %23 : vector<1x4x1xf32> to vector<1x4x256xf32>
    %25 = arith.mulf %0, %24 : vector<1x4x256xf32>
    %c0_15 = arith.constant 0 : index
    %c0_16 = arith.constant 0 : index
    %c0_17 = arith.constant 0 : index
    %26 = vector.load %arg6[%c0_15, %c0_16, %c0_17] : memref<1x4x256xf32, #tpu.memory_space<vmem>>, vector<1x4x256xf32>
    tpu.vector_store %arg6[%c0_15, %c0_16, %c0_17], %25 {strides = array<i32>} : memref<1x4x256xf32, #tpu.memory_space<vmem>>, vector<1x4x256xf32>,
    return
  }
  func.func @transform_0(%arg0: i32) -> (i32, i32, i32) {
    %c0_i32 = arith.constant 0 : i32
    %c0_i32_0 = arith.constant 0 : i32
    %c0_i32_1 = arith.constant 0 : i32
    return %arg0, %c0_i32, %c0_i32_0 : i32, i32, i32
  }
  func.func @transform_1(%arg0: i32) -> (i32, i32) {
    %c0_i32 = arith.constant 0 : i32
    %c0_i32_0 = arith.constant 0 : i32
    %c0_i32_1 = arith.constant 0 : i32
    return %c0_i32, %c0_i32_0 : i32, i32
  }
  func.func @transform_2(%arg0: i32) -> (i32, i32) {
    %c0_i32 = arith.constant 0 : i32
    %c0_i32_0 = arith.constant 0 : i32
    %c0_i32_1 = arith.constant 0 : i32
    return %c0_i32, %c0_i32_0 : i32, i32
  }
  func.func @transform_3(%arg0: i32) -> (i32, i32) {
    %c0_i32 = arith.constant 0 : i32
    %c0_i32_0 = arith.constant 0 : i32
    %c0_i32_1 = arith.constant 0 : i32
    return %c0_i32, %c0_i32_0 : i32, i32
  }
  func.func @transform_4(%arg0: i32) -> (i32, i32) {
    %c0_i32 = arith.constant 0 : i32
    %c0_i32_0 = arith.constant 0 : i32
    %c0_i32_1 = arith.constant 0 : i32
    return %c0_i32, %c0_i32_0 : i32, i32
  }
  func.func @transform_5(%arg0: i32) -> (i32, i32, i32) {
    %c0_i32 = arith.constant 0 : i32
    %c0_i32_0 = arith.constant 0 : i32
    %c0_i32_1 = arith.constant 0 : i32
    return %arg0, %c0_i32, %c0_i32_0 : i32, i32, i32
  }
}

</mosaic_0001>

<bundles_post_ra>
// kernel: tpu_custom_call.1
= control target key start
LH: loop header
LB: loop body
LE: loop exit
PB: predicated region body
PF: predicated region fallthrough
CT: control target
= control target key end

     0   :  { %10 = vsyncpa [#allocation3], 0  ;;  %s908_s0 = inlined_call_operand.hbm [shape: f32[2,4,256], index: 0, kind: input, shape index: {}]   ;;  %s909_s1 = inlined_call_operand.vmem [shape: f32[4,8], index: 1, kind: input, shape index: {}]   ;;  %s910_s2 = inlined_call_operand.vmem [shape: f32[1,8], index: 2, kind: input, shape index: {}]   ;;  %s911_s3 = inlined_call_operand.vmem [shape: f32[8,4], index: 3, kind: input, shape index: {}]   ;;  %s912_s4 = inlined_call_operand.vmem [shape: f32[1,4], index: 4, kind: input, shape index: {}]   ;;  %s913_s5 = inlined_call_operand.hbm [shape: f32[2,4,256], index: 5, kind: output, shape index: {}]  }
   0x1   :  { %12 = vsyncpa [#allocation3 + $0x1], 0 }
   0x2   :  { %13 = vsyncpa [#allocation4], 0 }
   0x3   :  { %15 = vsyncpa [#allocation4 + $0x1], 0  ;;  %s751_s18 = smov 0   ;;  %s753_s19 = smov 0  }
   0x4   :  { %s755_s20 = smov 0   ;;  %s757_s21 = smov 0  }
   0x5 LB: > { %s772_s22 = sadd.s32 4294967295, %s714_s21   ;;  %s529_s23 = sadd.s32 4294967294, %s714_s21   ;;  %s714_s21 = sphi %s757_s21, %s930_s21   ;;  %s710_s20 = sphi %s755_s20, %s929_s20   ;;  %s706_s19 = sphi %s753_s19, %s928_s19   ;;  %s702_s18 = sphi %s751_s18, %s927_s18  }
   0x6   : > { %s776_s24 = sadd.s32 1, %s714_s21   ;;  %s28_s25 = sadd.s32 1, %s710_s20 }
   0x7   : > { %s25_s26 = ssub.s32 %s714_s21, %s776_s24  ;;  %p35_p0 = scmp.ne.s32.totalorder %s710_s20, %s706_s19 }
   0x8   : > { %p26_p1 = scmp.eq.s32.totalorder %s25_s26, 0  ;;  %p36_p2 = scmp.eq.s32.totalorder %s714_s21, 0 }
   0x9   : > { %p41_p3 = scmp.ne.s32.totalorder %s706_s19, %s702_s18  ;;  %p42_p4 = scmp.eq.s32.totalorder %s772_s22, 0 }
   0xa   : > { %s788_s27 = scalar_select %p26_p1, %s710_s20, %s28_s25  }
   0xb   : > { %p790_p5 = por %p36_p2, %p35_p0  ;;  %p794_p6 = por %p42_p4, %p41_p3 }
   0xc   : > { %p149_p7 = scmp.eq.s32.totalorder %s772_s22, 1  ;;  %p155_p8 = scmp.eq.s32.totalorder %s529_s23, 1 }
   0xd   : > { %s917_s29 = scalar_select %p794_p6, 1, 0 }
   0xe   : > { %p576_p10 = scmp.lt.s32.totalorder %s714_s21, 2  ;;  %p801_p11 = por %p149_p7, %p35_p0 }
   0xf   : > { %p805_p12 = por %p155_p8, %p41_p3  ;;  %s187_s7 = sand.u32 1, %s710_s20  }
  0x10   : > { %s918_s30 = scalar_select %p801_p11, 1, 0 }
  0x11   : > { %s919_s6 = scalar_select %p805_p12, 1, 0 }
  0x12   : > { %s548_s8 = sshll.u32 %s714_s21, 7  ;;  %s532_s9 = sshll.u32 %s187_s7, 3 }
  0x13   : > { %s814_s12 = scalar_lea.hbm %s908_s0, %s548_s8  ;;  %s191_s13 = scalar_lea.vmem [#allocation2], %s532_s9 }
  0x14   : > { %s199_s14 = sshll.u32 %s191_s13, 4  ;;  %p818_p13 = pnand %p576_p10, %p790_p5  ;;  %s822_s14 = int_to_ptr.vmem [resolvable:$true] %s199_s14 }
  0x15   : > { %s188_s16 = scalar_lea.sflag [#allocation3], %s187_s7  ;;  %s622_s17 = scalar_lea.hbm %s814_s12, 128 }
  0x16   : > { %p623_p2 = scmp.ne.s32.totalorder %s814_s12, %s622_s17  ;;  %p624_p3 = pneg %p818_p13 }
  0x17   : > { %s627_s26 = scalar_lea.hbm %s908_s0, 256  ;;  %p628_p5 = scmp.lt.s32.totalorder %s814_s12, %s908_s0 }
  0x18   : > { %p625_p4 = pnand %p624_p3, %p623_p2  ;;  %p629_p8 = scmp.lt.s32.totalorder %s627_s26, %s622_s17 }
  0x1a   : > { %p626_p7 = pneg %p625_p4  ;;  %p630_p10 = por %p629_p8, %p628_p5 }
  0x1c   : > { %p631_p9 = pnand %p630_p10, %p626_p7 }
  0x1e   : > { %634 = shalt.err (!%p631_p9)
}
  0x1f   : > { %s635_s7 = scalar_lea.vmem %s822_s14, 128  ;;  %s716_s9 = smov [#allocation2]  }
  0x20   : > { %p636_p0 = scmp.ne.s32.totalorder %s822_s14, %s635_s7  ;;  %s640_s10 = sshll.u32 %s716_s9, 4  ;;  %s641_s10 = int_to_ptr.vmem [resolvable:$false] %s640_s10 }
  0x21   : > { %s642_s11 = scalar_lea.vmem %s641_s10, 256  ;;  %p643_p4 = scmp.lt.s32.totalorder %s822_s14, %s641_s10 }
  0x22   : > { %p638_p1 = pnand %p636_p0, %p624_p3  ;;  %p644_p12 = scmp.lt.s32.totalorder %s642_s11, %s635_s7 }
  0x24   : > { %p639_p2 = pneg %p638_p1  ;;  %p645_p11 = por %p644_p12, %p643_p4 }
  0x26   : > { %p646_p6 = pnand %p645_p11, %p639_p2 }
  0x28   : > { %649 = shalt.err (!%p646_p6)
}
  0x29   : > { %571 = dma.hbm_to_vmem [thread:$0]  (!%p818_p13), %s814_s12, 128, %s822_s14, %s188_s16  }
  0x2a   : > { %p921_p9 = scmp.lt.s32.totalorder %s714_s21, 3  ;;  %p922_p7 = scmp.ge.s32.totalorder %s714_s21, 1 }
  0x2c   : > { %p205_p0 = pnand %p922_p7, %p921_p9 }
  0x2d   : > { %s849_s13 = sand.u32 (!%p205_p0), 1, %s706_s19   ;;  %p923_p6 = scmp.ne.s32.totalorder (!%p205_p0), %s917_s29, 0 }
  0x2e   : > { %208 = sbr.rel (%p205_p0) target bundleno = 790 (0x316), region = 40  ;;  %s536_s17 = sshll.u32 (!%p205_p0), %s849_s13, 3 }
  0x2f   : > { %s211_s23 = scalar_lea.sflag (!%p205_p0), [#allocation3], %s849_s13  ;;  %s214_s15 = scalar_lea.vmem (!%p205_p0), [#allocation2], %s536_s17 }
  0x33   : > { %693 = dma.done.wait (%p923_p6), %s211_s23, 128  }
  0x34   : > { %695 = vsyncadd (%p923_p6), %s211_s23, 4294967168  ;;  %vm245_vm0 = vcmask 1043456   ;;  %v241_v0 = vld [vmem:[%s214_s15] sm:$0xff]  ;;  %v717_v5 = vmov 0.0   ;;  %vm718_vm1 = vmmov 0   ;;  %v255_v7 = vlaneseq  ;;  %s549_s7 = sshll.u32 %s772_s22, 7 }
  0x35   : > { %v243_v1 = vcombine.high %v241_v0, %v241_v0  ;;  %v246_v2 = vsel %vm245_vm0, %v241_v0, 0.0  ;;  %554 = vmatprep.subr.mxu0 %v717_v5  ;;  %v252_v6 = vld [vmem:[%s909_s1] sm:$0xf]  ;;  %559 = vmatprep.subr.mxu1 %v717_v5  ;;  %vm261_vm2 = vcmask 31744   ;;  %vm346_vm3 = vcmask 64512   ;;  %s240_s9 = scalar_lea.vmem [#allocation5], %s536_s17  ;;  %s457_s15 = scalar_lea.hbm %s913_s5, %s549_s7 }
  0x36   : > { %555 = vmatpush3.msk.msra.mxu0 %vm245_vm0, %v252_v6  ;;  %556 = vmatprep.mubr.msk.f32.mxu0 %vm718_vm1, %v717_v5  ;;  %v256_v8 = vand.u32 127, %v255_v7  ;;  %v258_v9 = vshrl.u32 %v255_v7, 7  ;;  %v344_v14 = vld [vmem:[%s911_s3] sm:$0xff]  ;;  %v719_v34 = vmov 839922192   ;;  %s459_s10 = sshll.u32 %s240_s9, 4  ;;  %s460_s10 = int_to_ptr.vmem [resolvable:$true] %s459_s10 }
  0x37   : > { %v247_v3 = vsel %vm245_vm0, %v243_v1, 0.0  ;;  %561 = vmatprep.mubr.msk.f32.mxu1 %vm718_vm1, %v717_v5  ;;  %560 = vmatpush3.msra.mxu1 %v344_v14  ;;  %v253_v15 = vld [vmem:[%s910_s2] sm:$0x1]  ;;  %v435_v35 = vunpack.c.l.s4 %v719_v34  ;;  %s445_s12 = scalar_lea.sflag [#allocation4], %s849_s13  ;;  %s650_s14 = scalar_lea.vmem %s460_s10, 128 }
  0x38   : > { %v248_v4 = vadd.f32 %v247_v3, %v246_v2  ;;  %v259_v10 = vsub.s32 %v256_v8, %v258_v9  ;;  %v345_v24 = vld [vmem:[%s912_s4] sm:$0x1]  ;;  %v428_v31 = vsub.s32 0, %v258_v9  ;;  %p651_p11 = scmp.ne.s32.totalorder %s460_s10, %s650_s14  ;;  %p924_p12 = scmp.ne.s32.totalorder %s918_s30, 0 }
  0x39   : > { %v436_v36 = vunpack.c.0.s8 %v435_v35  ;;  %s720_s29 = smov [#allocation5]  }
  0x3a   : > { %249 = vadd.xlane.f32.xlu0 %v248_v4  ;;  %p652_p13 = pnand %p651_p11, %p924_p12  ;;  %s654_s16 = sshll.u32 %s720_s29, 4  ;;  %s655_s16 = int_to_ptr.vmem [resolvable:$false] %s654_s16 }
  0x3b   : > { %v439_v37 = vsub.s32 %v436_v36, %v258_v9  ;;  %s656_s22 = scalar_lea.vmem %s655_s16, 256  ;;  %p657_p3 = scmp.lt.s32.totalorder %s460_s10, %s655_s16 }
  0x3c   : > { %p653_p1 = pneg %p652_p13  ;;  %p658_p5 = scmp.lt.s32.totalorder %s656_s22, %s650_s14 }
  0x3e   : > { %p659_p8 = por %p658_p5, %p657_p3 }
  0x40   : > { %p660_p10 = pnand %p659_p8, %p653_p1 }
  0xc3   : > { %v250_v11 = vpop.xlane.xlu0 %249 }
  0xc4   : > { %v251_v12 = vmul.f32 0.00390625, %v250_v11 }
  0xc6   : > { %v260_v13 = vrot.slane %v251_v12, %v259_v10 }
  0xc8   : > { %557 = vmatmul.mubr.msk.f32.vlgmr.msra.gmra.mxu0 %vm261_vm2, %v260_v13 }
 0x188   : > { %v333_v16 = vpop.f32.mrf.mxu0 }
 0x189   : > { %v334_v17 = vadd.f32 %v333_v16, %v253_v15 }
 0x18a   : > { %v558_v18 = vpop.f32.mrf.mxu0 }
 0x18b   : > { %v540_v19 = vmul.f32 -1.442695, %v334_v17 }
 0x18d   : > { %614 = vpow2.f32 %v540_v19 }
 0x19a   : > { %v615_v20 = vpop.eup %614 }
 0x19b   : > { %v340_v21 = vadd.f32 1.0, %v615_v20 }
 0x19d   : > { %616 = vrcp.f32 %v340_v21 }
 0x1aa   : > { %v617_v22 = vpop.eup %616 }
 0x1ab   : > { %v343_v23 = vmul.f32 %v617_v22, %v334_v17 }
 0x1ad   : > { %562 = vmatmul.mubr.msk.f32.vlgmr.msra.gmra.mxu1 %vm346_vm3, %v343_v23 }
 0x26d   : > { %v416_v25 = vpop.f32.mrf.mxu1 }
 0x26e   : > { %v417_v26 = vadd.f32 %v416_v25, %v345_v24 }
 0x26f   : > { %v563_v27 = vpop.f32.mrf.mxu1 }
 0x270   : > { %v542_v28 = vmul.f32 -1.442695, %v417_v26 }
 0x272   : > { %618 = vpow2.f32 %v542_v28 }
 0x27f   : > { %v619_v29 = vpop.eup %618 }
 0x280   : > { %v423_v30 = vadd.f32 1.0, %v619_v29 }
 0x282   : > { %620 = vrcp.f32 %v423_v30 }
 0x28f   : > { %v621_v32 = vpop.eup %620 }
 0x290   : > { %v429_v33 = vrot.slane %v621_v32, %v428_v31 }
 0x292   : > { %431 = vbcast.lane.b32.xlu0 %v429_v33, 256 }
 0x304   : > { %v432_v38 = vpop.permute.xlu0 %431 }
 0x305   : > { %v440_v39 = vrot.slane %v432_v38, %v439_v37 }
 0x307   : > { %v442_v40 = vmul.f32 %v440_v39, %v241_v0 }
 0x309   : > { %443 = vst [vmem:[%s240_s9] sm:$0xff] %v442_v40 }
 0x30a   : > { %663 = shalt.err (!%p660_p10)
}
 0x30b   : > { %s664_s17 = scalar_lea.hbm %s457_s15, 128  ;;  %s668_s26 = scalar_lea.hbm %s913_s5, 256 }
 0x30c   : > { %p665_p2 = scmp.ne.s32.totalorder %s457_s15, %s664_s17  ;;  %p669_p7 = scmp.lt.s32.totalorder %s457_s15, %s913_s5 }
 0x30d   : > { %p670_p0 = scmp.lt.s32.totalorder %s668_s26, %s664_s17 }
 0x30e   : > { %p666_p4 = pnand %p665_p2, %p924_p12 }
 0x30f   : > { %p671_p6 = por %p670_p0, %p669_p7 }
 0x310   : > { %p667_p9 = pneg %p666_p4 }
 0x312   : > { %p672_p11 = pnand %p671_p6, %p667_p9 }
 0x314   : > { %675 = shalt.err (!%p672_p11)
}
 0x315   : > { %566 = dma.vmem_to_hbm [thread:$0]  (%p924_p12), %s460_s10, 128, %s457_s15, %s445_s12  }
 0x316 PF: > { %s471_s7 = sand.u32 1, %s702_s18   ;;  %p925_p13 = scmp.ne.s32.totalorder %s919_s6, 0 }
 0x317   : > { %p926_p1 = scmp.ge.s32.totalorder %s714_s21, 2  ;;  %s472_s9 = scalar_lea.sflag [#allocation4], %s471_s7 }
 0x319   : > { %p573_p3 = pnand %p926_p1, %p925_p13 }
 0x31b   : > { %p574_p5 = pneg %p573_p3 }
 0x31d   : > { %697 = dma.done.wait (%p574_p5), %s472_s9, 128  }
 0x31e   : > { %699 = vsyncadd (%p574_p5), %s472_s9, 4294967168  ;;  %p18_p8 = scmp.ge.s32.totalorder %s776_s24, 4   ;;  %s927_s18 = smov %s706_s19 }
 0x31f   : > { %s928_s19 = smov %s710_s20  ;;  %s929_s20 = smov %s788_s27 }
 0x320   : > { %s930_s21 = smov %s776_s24  ;;  %20 = sbr.rel (!%p18_p8) target bundleno = 5 (0x5), region = 85 }
 0x325   :  { %477 = vsyncpa [#allocation3], 1 }
 0x326   :  { %479 = vsyncpa [#allocation3 + $0x1], 1 }
 0x327   :  { %480 = vsyncpa [#allocation4], 1 }
 0x328   :  { %482 = vsyncpa [#allocation4 + $0x1], 1 }

</bundles_post_ra>
